<compile_context>
chip_gen: v5e
topology: v5e:2x2
jax: 0.10.0
libtpu: 0.0.40
codegen_flags: <defaults>
</compile_context>

<pallas_src>
import functools

import jax
import jax.numpy as jnp
from jax.experimental import pallas as pl
from jax.experimental.pallas import tpu as pltpu


def _round_up(x, m):
    return (x + m - 1) // m * m


def _conv_relu_kernel(x_ref, w_ref, o_ref, xcol_ref, *, K, Wp, Cin_p, L_pad, NB):
    # x_ref:    (NB, Cin_p, Lin_pad)   flattened, zero-padded images (VMEM)
    # w_ref:    (Cout_p, K*K*Cin_p)    reshaped weight (VMEM)
    # o_ref:    (NB, Cout_p, L_pad)    lane-dense output block (VMEM)
    # xcol_ref: (K*K*Cin_p, NB*L_pad)  persistent aligned im2col scratch (VMEM)
    #
    # Stage every tap of every image into the aligned scratch.  All slice
    # starts/extents are static: rows at multiples of Cin_p (8/16-aligned),
    # columns at multiples of L_pad (128-aligned) -> unmasked stores; the only
    # unaligned access is the lane-shifted *read* of the tap, which is
    # intrinsic to im2col-by-shift.
    for n in range(NB):
        for kh in range(K):
            for kw in range(K):
                t = kh * K + kw
                off = kh * Wp + kw
                xcol_ref[t * Cin_p:(t + 1) * Cin_p,
                         n * L_pad:(n + 1) * L_pad] = x_ref[n, :, off:off + L_pad]

    # Single fused MXU matmul over the whole K*K*Cin contraction and all NB
    # images at once; accumulate in f32.
    acc = jnp.dot(w_ref[...], xcol_ref[...],
                  preferred_element_type=jnp.float32)     # (Cout_p, NB*L_pad)

    # ReLU + store, one lane-dense (Cout_p, L_pad) slab per image.
    for n in range(NB):
        o_ref[n] = jnp.maximum(
            acc[:, n * L_pad:(n + 1) * L_pad], 0.0).astype(o_ref.dtype)


@functools.partial(jax.jit,
                   static_argnames=("kernel_size", "stride", "compute_dtype"))
def basic_conv_forward(x_nchw, weight_oikk, *, kernel_size, stride=1,
                       compute_dtype=jnp.float32):
    """ReLU(Conv2d(x)) with padding=kernel_size//2, bias=False, groups=1."""
    assert stride == 1, "this kernel implements the stride=1 case"
    K = kernel_size
    assert K % 2 == 1, "even kernel_size (asymmetric PyTorch output) not implemented"

    N, Cin, H, W = x_nchw.shape
    Cout = weight_oikk.shape[0]
    pad = K // 2
    Hp, Wp = H + 2 * pad, W + 2 * pad

    itemsize = jnp.dtype(compute_dtype).itemsize
    sub_align = 16 if itemsize == 2 else 8        # sublane packing (bf16 vs f32)
    Cin_p = _round_up(Cin, sub_align)
    Cout_p = _round_up(Cout, 8)

    # Output columns per image = L (only first W of each Wp-row are real); pad
    # the lane extent to a multiple of 128 so every output/scratch row is a
    # whole number of vregs -> unmasked stores.
    L = H * Wp
    L_pad = _round_up(L, 128)
    max_off = (K - 1) * Wp + (K - 1)
    Lin = max(L_pad + max_off, Hp * Wp)
    Lin_pad = _round_up(Lin, 128)

    # --- wrapper-side layout glue (cheap, plain JAX; no transposes of x) ----
    # NCHW -> zero-pad spatial -> pad Cin to Cin_p -> flatten (Hp,Wp) -> pad L.
    x_pad = jnp.pad(x_nchw, ((0, 0), (0, Cin_p - Cin), (pad, pad), (pad, pad)))
    x_flat = x_pad.reshape(N, Cin_p, Hp * Wp).astype(compute_dtype)
    x_flat = jnp.pad(x_flat, ((0, 0), (0, 0), (0, Lin_pad - Hp * Wp)))

    # (Cout, Cin, K, K) -> (Cout_p, K*K*Cin_p), row order (kh, kw, c) matching
    # the im2col row order built inside the kernel.  Padded rows/channels = 0.
    w_p = jnp.pad(weight_oikk,
                  ((0, Cout_p - Cout), (0, Cin_p - Cin), (0, 0), (0, 0)))
    w_mat = jnp.transpose(w_p, (0, 2, 3, 1)).reshape(
        Cout_p, K * K * Cin_p).astype(compute_dtype)

    # --- batch folding heuristic: at demo sizes the ~600-cycle per-grid-step
    # overhead dominates, so fold the whole batch into ONE grid step (one big
    # matmul).  Fall back to grid=(N,) when the folded blocks would be large.
    per_img_bytes = (Cin_p * Lin_pad * itemsize                 # input block
                     + Cout_p * L_pad * x_nchw.dtype.itemsize   # output block
                     + K * K * Cin_p * L_pad * itemsize)        # xcol scratch
    NB = N if N * per_img_bytes <= 8 * 1024 * 1024 else 1
    grid = (N // NB,)

    kernel = functools.partial(_conv_relu_kernel, K=K, Wp=Wp, Cin_p=Cin_p,
                               L_pad=L_pad, NB=NB)

    flops = 2 * N * Cout * Cin * K * K * H * W
    bytes_accessed = (x_flat.size * itemsize + w_mat.size * itemsize
                      + N * Cout_p * L_pad * x_nchw.dtype.itemsize)

    out_flat = pl.pallas_call(
        kernel,
        out_shape=jax.ShapeDtypeStruct((N, Cout_p, L_pad), x_nchw.dtype),
        grid_spec=pltpu.PrefetchScalarGridSpec(
            num_scalar_prefetch=0,
            grid=grid,
            in_specs=[
                pl.BlockSpec((NB, Cin_p, Lin_pad), lambda b: (b, 0, 0)),
                pl.BlockSpec((Cout_p, K * K * Cin_p), lambda b: (0, 0)),
            ],
            out_specs=pl.BlockSpec((NB, Cout_p, L_pad), lambda b: (b, 0, 0)),
            scratch_shapes=[
                # Persistent, (8,128)-aligned im2col staging buffer, reused
                # across grid steps; fully overwritten every step.
                pltpu.VMEM((K * K * Cin_p, NB * L_pad), compute_dtype),
            ],
        ),
        compiler_params=pltpu.CompilerParams(
            dimension_semantics=("parallel",),
            vmem_limit_bytes=32 * 1024 * 1024,
        ),
        cost_estimate=pl.CostEstimate(
            flops=flops, transcendentals=0, bytes_accessed=bytes_accessed),
    )(x_flat, w_mat)

    # (N, Cout_p, L_pad) -> drop padded channels / padded & throwaway columns.
    # Result is already NCHW: no transpose needed.  NOTE: the padded columns
    # hold well-defined-but-meaningless values and MUST be sliced off here.
    return out_flat[:, :Cout, :L].reshape(N, Cout, H, Wp)[:, :, :, :W]


def _reference(x_nchw, weight_oikk, kernel_size, stride=1):
    pad = kernel_size // 2
    y = jax.lax.conv_general_dilated(
        x_nchw, weight_oikk,
        window_strides=(stride, stride),
        padding=((pad, pad), (pad, pad)),
        dimension_numbers=("NCHW", "OIHW", "NCHW"))
    return jnp.maximum(y, 0.0)


if __name__ == "__main__":
    # Small shapes consistent with the module: batch=2, Cin=4, Cout=8, 16x16.
    N, Cin, Cout, H, W, K = 2, 4, 8, 16, 16, 3
    key = jax.random.PRNGKey(0)
    kx, kw = jax.random.split(key)
    x = jax.random.normal(kx, (N, Cin, H, W), dtype=jnp.float32)
    # Deterministic weight init (Conv2d weight shape: (Cout, Cin, K, K)).
    fan_in = Cin * K * K
    weight = jax.random.uniform(
        kw, (Cout, Cin, K, K), dtype=jnp.float32,
        minval=-1.0, maxval=1.0) / jnp.sqrt(fan_in)

    # f32 compute for an exact check; pass compute_dtype=jnp.bfloat16 on
    # v6e/v7x for 2x MXU throughput and half the DMA/VMEM bytes.
    out = basic_conv_forward(x, weight, kernel_size=K, stride=1)
    out = jax.block_until_ready(out)

    ref = _reference(x, weight, K, 1)
    assert out.shape == (N, Cout, H, W)
    assert jnp.allclose(out, ref, atol=1e-5, rtol=1e-5), "mismatch vs reference"

    print("KERNEL_OK")
</pallas_src>

<mosaic_0001>
module attributes {stable_mosaic.version = 11 : i64} {
  func.func @_conv_relu_kernel(%arg0: i32, %arg1: memref<2x8x512xf32, #tpu.memory_space<vmem>>, %arg2: memref<8x72xf32, #tpu.memory_space<vmem>>, %arg3: memref<2x8x384xf32, #tpu.memory_space<vmem>>, %arg4: memref<72x768xf32, #tpu.memory_space<vmem>>) attributes {dimension_semantics = [#tpu.dimension_semantics<parallel>], iteration_bounds = array<i64: 1>, scalar_prefetch = 0 : i64, scratch_operands = 1 : i64, tpu.core_type = #tpu.core_type<tc>, window_params = [{transform_indices = @transform_0, window_bounds = array<i64: 2, 8, 512>}, {pipeline_mode = #tpu.pipeline_mode<synchronous>, transform_indices = @transform_1, window_bounds = array<i64: 8, 72>}, {transform_indices = @transform_2, window_bounds = array<i64: 2, 8, 384>}]} {
    %c0 = arith.constant 0 : index
    %c0_0 = arith.constant 0 : index
    %c0_1 = arith.constant 0 : index
    %0 = vector.load %arg1[%c0, %c0_0, %c0_1] : memref<2x8x512xf32, #tpu.memory_space<vmem>>, vector<1x8x384xf32>
    %1 = vector.shape_cast %0 : vector<1x8x384xf32> to vector<8x384xf32>
    %c0_2 = arith.constant 0 : index
    %c0_3 = arith.constant 0 : index
    %2 = vector.load %arg4[%c0_2, %c0_3] : memref<72x768xf32, #tpu.memory_space<vmem>>, vector<8x384xf32>
    tpu.vector_store %arg4[%c0_2, %c0_3], %1 {strides = array<i32>} : memref<72x768xf32, #tpu.memory_space<vmem>>, vector<8x384xf32>,
    %c0_4 = arith.constant 0 : index
    %c0_5 = arith.constant 0 : index
    %c1 = arith.constant 1 : index
    %3 = vector.load %arg1[%c0_4, %c0_5, %c1] : memref<2x8x512xf32, #tpu.memory_space<vmem>>, vector<1x8x384xf32>
    %4 = vector.shape_cast %3 : vector<1x8x384xf32> to vector<8x384xf32>
    %c8 = arith.constant 8 : index
    %c0_6 = arith.constant 0 : index
    %5 = vector.load %arg4[%c8, %c0_6] : memref<72x768xf32, #tpu.memory_space<vmem>>, vector<8x384xf32>
    tpu.vector_store %arg4[%c8, %c0_6], %4 {strides = array<i32>} : memref<72x768xf32, #tpu.memory_space<vmem>>, vector<8x384xf32>,
    %c0_7 = arith.constant 0 : index
    %c0_8 = arith.constant 0 : index
    %c2 = arith.constant 2 : index
    %6 = vector.load %arg1[%c0_7, %c0_8, %c2] : memref<2x8x512xf32, #tpu.memory_space<vmem>>, vector<1x8x384xf32>
    %7 = vector.shape_cast %6 : vector<1x8x384xf32> to vector<8x384xf32>
    %c16 = arith.constant 16 : index
    %c0_9 = arith.constant 0 : index
    %8 = vector.load %arg4[%c16, %c0_9] : memref<72x768xf32, #tpu.memory_space<vmem>>, vector<8x384xf32>
    tpu.vector_store %arg4[%c16, %c0_9], %7 {strides = array<i32>} : memref<72x768xf32, #tpu.memory_space<vmem>>, vector<8x384xf32>,
    %c0_10 = arith.constant 0 : index
    %c0_11 = arith.constant 0 : index
    %c18 = arith.constant 18 : index
    %9 = vector.load %arg1[%c0_10, %c0_11, %c18] : memref<2x8x512xf32, #tpu.memory_space<vmem>>, vector<1x8x384xf32>
    %10 = vector.shape_cast %9 : vector<1x8x384xf32> to vector<8x384xf32>
    %c24 = arith.constant 24 : index
    %c0_12 = arith.constant 0 : index
    %11 = vector.load %arg4[%c24, %c0_12] : memref<72x768xf32, #tpu.memory_space<vmem>>, vector<8x384xf32>
    tpu.vector_store %arg4[%c24, %c0_12], %10 {strides = array<i32>} : memref<72x768xf32, #tpu.memory_space<vmem>>, vector<8x384xf32>,
    %c0_13 = arith.constant 0 : index
    %c0_14 = arith.constant 0 : index
    %c19 = arith.constant 19 : index
    %12 = vector.load %arg1[%c0_13, %c0_14, %c19] : memref<2x8x512xf32, #tpu.memory_space<vmem>>, vector<1x8x384xf32>
    %13 = vector.shape_cast %12 : vector<1x8x384xf32> to vector<8x384xf32>
    %c32 = arith.constant 32 : index
    %c0_15 = arith.constant 0 : index
    %14 = vector.load %arg4[%c32, %c0_15] : memref<72x768xf32, #tpu.memory_space<vmem>>, vector<8x384xf32>
    tpu.vector_store %arg4[%c32, %c0_15], %13 {strides = array<i32>} : memref<72x768xf32, #tpu.memory_space<vmem>>, vector<8x384xf32>,
    %c0_16 = arith.constant 0 : index
    %c0_17 = arith.constant 0 : index
    %c20 = arith.constant 20 : index
    %15 = vector.load %arg1[%c0_16, %c0_17, %c20] : memref<2x8x512xf32, #tpu.memory_space<vmem>>, vector<1x8x384xf32>
    %16 = vector.shape_cast %15 : vector<1x8x384xf32> to vector<8x384xf32>
    %c40 = arith.constant 40 : index
    %c0_18 = arith.constant 0 : index
    %17 = vector.load %arg4[%c40, %c0_18] : memref<72x768xf32, #tpu.memory_space<vmem>>, vector<8x384xf32>
    tpu.vector_store %arg4[%c40, %c0_18], %16 {strides = array<i32>} : memref<72x768xf32, #tpu.memory_space<vmem>>, vector<8x384xf32>,
    %c0_19 = arith.constant 0 : index
    %c0_20 = arith.constant 0 : index
    %c36 = arith.constant 36 : index
    %18 = vector.load %arg1[%c0_19, %c0_20, %c36] : memref<2x8x512xf32, #tpu.memory_space<vmem>>, vector<1x8x384xf32>
    %19 = vector.shape_cast %18 : vector<1x8x384xf32> to vector<8x384xf32>
    %c48 = arith.constant 48 : index
    %c0_21 = arith.constant 0 : index
    %20 = vector.load %arg4[%c48, %c0_21] : memref<72x768xf32, #tpu.memory_space<vmem>>, vector<8x384xf32>
    tpu.vector_store %arg4[%c48, %c0_21], %19 {strides = array<i32>} : memref<72x768xf32, #tpu.memory_space<vmem>>, vector<8x384xf32>,
    %c0_22 = arith.constant 0 : index
    %c0_23 = arith.constant 0 : index
    %c37 = arith.constant 37 : index
    %21 = vector.load %arg1[%c0_22, %c0_23, %c37] : memref<2x8x512xf32, #tpu.memory_space<vmem>>, vector<1x8x384xf32>
    %22 = vector.shape_cast %21 : vector<1x8x384xf32> to vector<8x384xf32>
    %c56 = arith.constant 56 : index
    %c0_24 = arith.constant 0 : index
    %23 = vector.load %arg4[%c56, %c0_24] : memref<72x768xf32, #tpu.memory_space<vmem>>, vector<8x384xf32>
    tpu.vector_store %arg4[%c56, %c0_24], %22 {strides = array<i32>} : memref<72x768xf32, #tpu.memory_space<vmem>>, vector<8x384xf32>,
    %c0_25 = arith.constant 0 : index
    %c0_26 = arith.constant 0 : index
    %c38 = arith.constant 38 : index
    %24 = vector.load %arg1[%c0_25, %c0_26, %c38] : memref<2x8x512xf32, #tpu.memory_space<vmem>>, vector<1x8x384xf32>
    %25 = vector.shape_cast %24 : vector<1x8x384xf32> to vector<8x384xf32>
    %c64 = arith.constant 64 : index
    %c0_27 = arith.constant 0 : index
    %26 = vector.load %arg4[%c64, %c0_27] : memref<72x768xf32, #tpu.memory_space<vmem>>, vector<8x384xf32>
    tpu.vector_store %arg4[%c64, %c0_27], %25 {strides = array<i32>} : memref<72x768xf32, #tpu.memory_space<vmem>>, vector<8x384xf32>,
    %c1_28 = arith.constant 1 : index
    %c0_29 = arith.constant 0 : index
    %c0_30 = arith.constant 0 : index
    %27 = vector.load %arg1[%c1_28, %c0_29, %c0_30] : memref<2x8x512xf32, #tpu.memory_space<vmem>>, vector<1x8x384xf32>
    %28 = vector.shape_cast %27 : vector<1x8x384xf32> to vector<8x384xf32>
    %c0_31 = arith.constant 0 : index
    %c384 = arith.constant 384 : index
    %29 = vector.load %arg4[%c0_31, %c384] : memref<72x768xf32, #tpu.memory_space<vmem>>, vector<8x384xf32>
    tpu.vector_store %arg4[%c0_31, %c384], %28 {strides = array<i32>} : memref<72x768xf32, #tpu.memory_space<vmem>>, vector<8x384xf32>,
    %c1_32 = arith.constant 1 : index
    %c0_33 = arith.constant 0 : index
    %c1_34 = arith.constant 1 : index
    %30 = vector.load %arg1[%c1_32, %c0_33, %c1_34] : memref<2x8x512xf32, #tpu.memory_space<vmem>>, vector<1x8x384xf32>
    %31 = vector.shape_cast %30 : vector<1x8x384xf32> to vector<8x384xf32>
    %c8_35 = arith.constant 8 : index
    %c384_36 = arith.constant 384 : index
    %32 = vector.load %arg4[%c8_35, %c384_36] : memref<72x768xf32, #tpu.memory_space<vmem>>, vector<8x384xf32>
    tpu.vector_store %arg4[%c8_35, %c384_36], %31 {strides = array<i32>} : memref<72x768xf32, #tpu.memory_space<vmem>>, vector<8x384xf32>,
    %c1_37 = arith.constant 1 : index
    %c0_38 = arith.constant 0 : index
    %c2_39 = arith.constant 2 : index
    %33 = vector.load %arg1[%c1_37, %c0_38, %c2_39] : memref<2x8x512xf32, #tpu.memory_space<vmem>>, vector<1x8x384xf32>
    %34 = vector.shape_cast %33 : vector<1x8x384xf32> to vector<8x384xf32>
    %c16_40 = arith.constant 16 : index
    %c384_41 = arith.constant 384 : index
    %35 = vector.load %arg4[%c16_40, %c384_41] : memref<72x768xf32, #tpu.memory_space<vmem>>, vector<8x384xf32>
    tpu.vector_store %arg4[%c16_40, %c384_41], %34 {strides = array<i32>} : memref<72x768xf32, #tpu.memory_space<vmem>>, vector<8x384xf32>,
    %c1_42 = arith.constant 1 : index
    %c0_43 = arith.constant 0 : index
    %c18_44 = arith.constant 18 : index
    %36 = vector.load %arg1[%c1_42, %c0_43, %c18_44] : memref<2x8x512xf32, #tpu.memory_space<vmem>>, vector<1x8x384xf32>
    %37 = vector.shape_cast %36 : vector<1x8x384xf32> to vector<8x384xf32>
    %c24_45 = arith.constant 24 : index
    %c384_46 = arith.constant 384 : index
    %38 = vector.load %arg4[%c24_45, %c384_46] : memref<72x768xf32, #tpu.memory_space<vmem>>, vector<8x384xf32>
    tpu.vector_store %arg4[%c24_45, %c384_46], %37 {strides = array<i32>} : memref<72x768xf32, #tpu.memory_space<vmem>>, vector<8x384xf32>,
    %c1_47 = arith.constant 1 : index
    %c0_48 = arith.constant 0 : index
    %c19_49 = arith.constant 19 : index
    %39 = vector.load %arg1[%c1_47, %c0_48, %c19_49] : memref<2x8x512xf32, #tpu.memory_space<vmem>>, vector<1x8x384xf32>
    %40 = vector.shape_cast %39 : vector<1x8x384xf32> to vector<8x384xf32>
    %c32_50 = arith.constant 32 : index
    %c384_51 = arith.constant 384 : index
    %41 = vector.load %arg4[%c32_50, %c384_51] : memref<72x768xf32, #tpu.memory_space<vmem>>, vector<8x384xf32>
    tpu.vector_store %arg4[%c32_50, %c384_51], %40 {strides = array<i32>} : memref<72x768xf32, #tpu.memory_space<vmem>>, vector<8x384xf32>,
    %c1_52 = arith.constant 1 : index
    %c0_53 = arith.constant 0 : index
    %c20_54 = arith.constant 20 : index
    %42 = vector.load %arg1[%c1_52, %c0_53, %c20_54] : memref<2x8x512xf32, #tpu.memory_space<vmem>>, vector<1x8x384xf32>
    %43 = vector.shape_cast %42 : vector<1x8x384xf32> to vector<8x384xf32>
    %c40_55 = arith.constant 40 : index
    %c384_56 = arith.constant 384 : index
    %44 = vector.load %arg4[%c40_55, %c384_56] : memref<72x768xf32, #tpu.memory_space<vmem>>, vector<8x384xf32>
    tpu.vector_store %arg4[%c40_55, %c384_56], %43 {strides = array<i32>} : memref<72x768xf32, #tpu.memory_space<vmem>>, vector<8x384xf32>,
    %c1_57 = arith.constant 1 : index
    %c0_58 = arith.constant 0 : index
    %c36_59 = arith.constant 36 : index
    %45 = vector.load %arg1[%c1_57, %c0_58, %c36_59] : memref<2x8x512xf32, #tpu.memory_space<vmem>>, vector<1x8x384xf32>
    %46 = vector.shape_cast %45 : vector<1x8x384xf32> to vector<8x384xf32>
    %c48_60 = arith.constant 48 : index
    %c384_61 = arith.constant 384 : index
    %47 = vector.load %arg4[%c48_60, %c384_61] : memref<72x768xf32, #tpu.memory_space<vmem>>, vector<8x384xf32>
    tpu.vector_store %arg4[%c48_60, %c384_61], %46 {strides = array<i32>} : memref<72x768xf32, #tpu.memory_space<vmem>>, vector<8x384xf32>,
    %c1_62 = arith.constant 1 : index
    %c0_63 = arith.constant 0 : index
    %c37_64 = arith.constant 37 : index
    %48 = vector.load %arg1[%c1_62, %c0_63, %c37_64] : memref<2x8x512xf32, #tpu.memory_space<vmem>>, vector<1x8x384xf32>
    %49 = vector.shape_cast %48 : vector<1x8x384xf32> to vector<8x384xf32>
    %c56_65 = arith.constant 56 : index
    %c384_66 = arith.constant 384 : index
    %50 = vector.load %arg4[%c56_65, %c384_66] : memref<72x768xf32, #tpu.memory_space<vmem>>, vector<8x384xf32>
    tpu.vector_store %arg4[%c56_65, %c384_66], %49 {strides = array<i32>} : memref<72x768xf32, #tpu.memory_space<vmem>>, vector<8x384xf32>,
    %c1_67 = arith.constant 1 : index
    %c0_68 = arith.constant 0 : index
    %c38_69 = arith.constant 38 : index
    %51 = vector.load %arg1[%c1_67, %c0_68, %c38_69] : memref<2x8x512xf32, #tpu.memory_space<vmem>>, vector<1x8x384xf32>
    %52 = vector.shape_cast %51 : vector<1x8x384xf32> to vector<8x384xf32>
    %c64_70 = arith.constant 64 : index
    %c384_71 = arith.constant 384 : index
    %53 = vector.load %arg4[%c64_70, %c384_71] : memref<72x768xf32, #tpu.memory_space<vmem>>, vector<8x384xf32>
    tpu.vector_store %arg4[%c64_70, %c384_71], %52 {strides = array<i32>} : memref<72x768xf32, #tpu.memory_space<vmem>>, vector<8x384xf32>,
    %c0_72 = arith.constant 0 : index
    %c0_73 = arith.constant 0 : index
    %54 = vector.load %arg2[%c0_72, %c0_73] : memref<8x72xf32, #tpu.memory_space<vmem>>, vector<8x72xf32>
    %c0_74 = arith.constant 0 : index
    %c0_75 = arith.constant 0 : index
    %55 = vector.load %arg4[%c0_74, %c0_75] : memref<72x768xf32, #tpu.memory_space<vmem>>, vector<72x768xf32>
    %cst = arith.constant dense<0.000000e+00> : vector<8x768xf32>
    %56 = tpu.matmul %54, %55, %cst {dimension_numbers = #tpu.dot_dimension_numbers<[1], [0], [0], [1], [0, 0, 1, 1], [], []>} : vector<8x72xf32>, vector<72x768xf32>, vector<8x768xf32> -> vector<8x768xf32>
    %57 = vector.extract_strided_slice %56 {offsets = [0, 0], sizes = [8, 384], strides = [1, 1]} : vector<8x768xf32> to vector<8x384xf32>
    %cst_76 = arith.constant 0.000000e+00 : f32
    %58 = vector.broadcast %cst_76 : f32 to vector<8x384xf32>
    %59 = arith.maximumf %57, %58 : vector<8x384xf32>
    %c0_77 = arith.constant 0 : index
    %c0_78 = arith.constant 0 : index
    %c0_79 = arith.constant 0 : index
    %60 = vector.load %arg3[%c0_77, %c0_78, %c0_79] : memref<2x8x384xf32, #tpu.memory_space<vmem>>, vector<1x8x384xf32>
    %61 = vector.shape_cast %60 : vector<1x8x384xf32> to vector<8x384xf32>
    %62 = vector.shape_cast %59 : vector<8x384xf32> to vector<1x8x384xf32>
    tpu.vector_store %arg3[%c0_77, %c0_78, %c0_79], %62 {strides = array<i32>} : memref<2x8x384xf32, #tpu.memory_space<vmem>>, vector<1x8x384xf32>,
    %63 = vector.extract_strided_slice %56 {offsets = [0, 384], sizes = [8, 384], strides = [1, 1]} : vector<8x768xf32> to vector<8x384xf32>
    %cst_80 = arith.constant 0.000000e+00 : f32
    %64 = vector.broadcast %cst_80 : f32 to vector<8x384xf32>
    %65 = arith.maximumf %63, %64 : vector<8x384xf32>
    %c1_81 = arith.constant 1 : index
    %c0_82 = arith.constant 0 : index
    %c0_83 = arith.constant 0 : index
    %66 = vector.load %arg3[%c1_81, %c0_82, %c0_83] : memref<2x8x384xf32, #tpu.memory_space<vmem>>, vector<1x8x384xf32>
    %67 = vector.shape_cast %66 : vector<1x8x384xf32> to vector<8x384xf32>
    %68 = vector.shape_cast %65 : vector<8x384xf32> to vector<1x8x384xf32>
    tpu.vector_store %arg3[%c1_81, %c0_82, %c0_83], %68 {strides = array<i32>} : memref<2x8x384xf32, #tpu.memory_space<vmem>>, vector<1x8x384xf32>,
    return
  }
  func.func @transform_0(%arg0: i32) -> (i32, i32, i32) {
    %c0_i32 = arith.constant 0 : i32
    %c0_i32_0 = arith.constant 0 : i32
    %c0_i32_1 = arith.constant 0 : i32
    return %arg0, %c0_i32, %c0_i32_0 : i32, i32, i32
  }
  func.func @transform_1(%arg0: i32) -> (i32, i32) {
    %c0_i32 = arith.constant 0 : i32
    %c0_i32_0 = arith.constant 0 : i32
    %c0_i32_1 = arith.constant 0 : i32
    return %c0_i32, %c0_i32_0 : i32, i32
  }
  func.func @transform_2(%arg0: i32) -> (i32, i32, i32) {
    %c0_i32 = arith.constant 0 : i32
    %c0_i32_0 = arith.constant 0 : i32
    %c0_i32_1 = arith.constant 0 : i32
    return %arg0, %c0_i32, %c0_i32_0 : i32, i32, i32
  }
}

</mosaic_0001>

<bundles_post_ra>
// kernel: basic_conv_forward.1
= control target key start
LH: loop header
LB: loop body
LE: loop exit
PB: predicated region body
PF: predicated region fallthrough
CT: control target
= control target key end

     0   :  { %s840_s17 = smov 90   ;;  %s841_s18 = smov 91   ;;  %vm215_vm0 = vcmask 736256   ;;  %vm189_vm1 = vcmask 744448   ;;  %vm163_vm2 = vcmask 752640   ;;  %vm137_vm3 = vcmask 883712   ;;  %s1045_s0 = inlined_call_operand.vmem [shape: f32[2,8,512], index: 0, kind: input, shape index: {}]   ;;  %s1046_s1 = inlined_call_operand.vmem [shape: f32[8,72], index: 1, kind: input, shape index: {}]   ;;  %s1047_s2 = inlined_call_operand.vmem [shape: f32[2,8,384], index: 2, kind: output, shape index: {}]  }
   0x1   :  { %v866_v0 = vld [vmem:[%s1045_s0 + $0x20] sm:$0xff]  ;;  %v871_v1 = vld [vmem:[%s1045_s0 + $0x28] sm:$0xff]  ;;  %v890_v6 = vld [vmem:[%s1045_s0 + $0x10] sm:$0xff]  ;;  %s842_s23 = smov 92   ;;  %s843_s24 = smov 108   ;;  %vm111_vm4 = vcmask 891904  }
   0x2   :  { %v876_v2 = vld [vmem:[%s1045_s0] sm:$0xff]  ;;  %v700_v3 = vpack.i.bf16 %v871_v1, %v866_v0  ;;  %v883_v4 = vld [vmem:[%s1045_s0 + $0x8] sm:$0xff]  ;;  %v202_v7 = vld [vmem:[%s1045_s0 + $0x18] sm:$0xff]  ;;  %s844_s25 = smov 109   ;;  %s845_s30 = smov 110   ;;  %vm85_vm5 = vcmask 900096  }
   0x3   :  { %v680_v5 = vpack.i.bf16 %v883_v4, %v876_v2  ;;  %v685_v8 = vpack.i.bf16 %v202_v7, %v890_v6  ;;  %v899_v9 = vld [vmem:[%s1045_s0 + $0x30] sm:$0xff]  ;;  %v662_v10 = vld [vmem:[%s1045_s0 + $0x38] sm:$0xff]  ;;  %s846_s3 = smov 126   ;;  %s847_s4 = smov 127   ;;  %vm59_vm6 = vcmask 1031168   ;;  %vm33_vm7 = vcmask 1039360  }
   0x4   :  { %701 = vrot.lane.b32.xlu2 %v700_v3, %s840_s17  ;;  %v750_v11 = vpack.i.bf16 %v662_v10, %v899_v9  ;;  %vm487_vm8 = vcmask 588800  }
   0x5   :  { %681 = vrot.lane.b32.xlu0 %v680_v5, %s840_s17  ;;  %691 = vrot.lane.b32.xlu1 %v680_v5, %s841_s18 }
   0xc   :  { %706 = vrot.lane.b32.xlu2 %v680_v5, %s842_s23 }
   0xd   :  { %686 = vrot.lane.b32.xlu0 %v685_v8, %s840_s17  ;;  %696 = vrot.lane.b32.xlu1 %v685_v8, %s841_s18 }
  0x14   :  { %721 = vrot.lane.b32.xlu2 %v680_v5, %s843_s24 }
  0x15   :  { %716 = vrot.lane.b32.xlu1 %v700_v3, %s841_s18  ;;  %711 = vrot.lane.b32.xlu0 %v685_v8, %s842_s23 }
  0x1c   :  { %736 = vrot.lane.b32.xlu2 %v680_v5, %s844_s25 }
  0x1d   :  { %731 = vrot.lane.b32.xlu1 %v700_v3, %s842_s23  ;;  %726 = vrot.lane.b32.xlu0 %v685_v8, %s843_s24 }
  0x24   :  { %751 = vrot.lane.b32.xlu2 %v750_v11, %s840_s17 }
  0x25   :  { %746 = vrot.lane.b32.xlu1 %v700_v3, %s843_s24  ;;  %741 = vrot.lane.b32.xlu0 %v685_v8, %s844_s25 }
  0x2c   :  { %766 = vrot.lane.b32.xlu2 %v700_v3, %s844_s25 }
  0x2d   :  { %761 = vrot.lane.b32.xlu1 %v685_v8, %s845_s30  ;;  %756 = vrot.lane.b32.xlu0 %v680_v5, %s845_s30 }
  0x34   :  { %781 = vrot.lane.b32.xlu2 %v685_v8, %s846_s3 }
  0x35   :  { %771 = vrot.lane.b32.xlu0 %v750_v11, %s841_s18  ;;  %776 = vrot.lane.b32.xlu1 %v680_v5, %s846_s3 }
  0x3c   :  { %796 = vrot.lane.b32.xlu2 %v680_v5, %s847_s4 }
  0x3d   :  { %786 = vrot.lane.b32.xlu0 %v700_v3, %s845_s30  ;;  %791 = vrot.lane.b32.xlu1 %v750_v11, %s842_s23 }
  0x44   :  { %811 = vrot.lane.b32.xlu2 %v750_v11, %s843_s24 }
  0x45   :  { %806 = vrot.lane.b32.xlu1 %v700_v3, %s846_s3  ;;  %801 = vrot.lane.b32.xlu0 %v685_v8, %s847_s4 }
  0x4c   :  { %826 = vrot.lane.b32.xlu2 %v750_v11, %s845_s30 }
  0x4d   :  { %821 = vrot.lane.b32.xlu1 %v750_v11, %s844_s25  ;;  %816 = vrot.lane.b32.xlu0 %v700_v3, %s847_s4 }
  0x55   :  { %836 = vrot.lane.b32.xlu1 %v750_v11, %s847_s4  ;;  %831 = vrot.lane.b32.xlu0 %v750_v11, %s846_s3 }
  0x5e   :  { %v702_v12 = vpop.permute.xlu2 %701 }
  0x5f   :  { %v704_v13 = vunpack.i.h.bf16 %v702_v12  ;;  %v703_v14 = vunpack.i.l.bf16 %v702_v12 }
  0x61   :  { %v423_v15 = vsel %vm215_vm0, %v703_v14, %v704_v13 }
  0x62   :  { %558 = vmatpush.msra.mxu3 %v423_v15 }
  0x66   :  { %v707_v16 = vpop.permute.xlu2 %706 }
  0x67   :  { %v709_v19 = vunpack.i.h.bf16 %v707_v16  ;;  %v708_v20 = vunpack.i.l.bf16 %v707_v16 }
  0x69   :  { %v164_v31 = vsel %vm163_vm2, %v708_v20, %v709_v19 }
  0x6e   :  { %v906_v17 = vpop.permute.xlu2 %721 }
  0x6f   :  { %v724_v27 = vunpack.i.h.bf16 %v906_v17  ;;  %v723_v28 = vunpack.i.l.bf16 %v906_v17 }
  0x71   :  { %v138_v35 = vsel %vm137_vm3, %v723_v28, %v724_v27 }
  0x76   :  { %v908_v18 = vpop.permute.xlu2 %736 }
  0x77   :  { %v682_v21 = vpop.permute.xlu0 %681  ;;  %v692_v22 = vpop.permute.xlu1 %691  ;;  %v739_v32 = vunpack.i.h.bf16 %v908_v18  ;;  %v738_v33 = vunpack.i.l.bf16 %v908_v18 }
  0x78   :  { %v684_v23 = vunpack.i.h.bf16 %v682_v21  ;;  %v683_v24 = vunpack.i.l.bf16 %v682_v21  ;;  %v694_v25 = vunpack.i.h.bf16 %v692_v22  ;;  %v693_v26 = vunpack.i.l.bf16 %v692_v22 }
  0x79   :  { %v112_v43 = vsel %vm111_vm4, %v738_v33, %v739_v32 }
  0x7a   :  { %v216_v29 = vsel %vm215_vm0, %v683_v24, %v684_v23  ;;  %v190_v30 = vsel %vm189_vm1, %v693_v26, %v694_v25 }
  0x7b   :  { %498 = vmatpush.msra.mxu0 %v216_v29 }
  0x7d   :  { %499 = vmatpush.msra.mxu0 %v190_v30 }
  0x7e   :  { %v917_v34 = vpop.permute.xlu2 %751 }
  0x7f   :  { %v687_v36 = vpop.permute.xlu0 %686  ;;  %v697_v37 = vpop.permute.xlu1 %696  ;;  %v753_v38 = vunpack.i.l.bf16 %v917_v34  ;;  %500 = vmatpush.msra.mxu0 %v164_v31 }
  0x80   :  { %v689_v39 = vunpack.i.h.bf16 %v687_v36  ;;  %v688_v40 = vunpack.i.l.bf16 %v687_v36  ;;  %v699_v41 = vunpack.i.h.bf16 %v697_v37  ;;  %v698_v42 = vunpack.i.l.bf16 %v697_v37 }
  0x81   :  { %501 = vmatpush.msra.mxu0 %v138_v35  ;;  %v925_v44 = vsel %vm215_vm0, %v704_v13, %v753_v38 }
  0x82   :  { %v217_v45 = vsel %vm215_vm0, %v684_v23, %v688_v40  ;;  %v218_v46 = vsel %vm215_vm0, %v688_v40, %v689_v39  ;;  %v192_v47 = vsel %vm189_vm1, %v698_v42, %v699_v41  ;;  %v191_v48 = vsel %vm189_vm1, %v694_v25, %v698_v42 }
  0x83   :  { %518 = vmatpush.msra.mxu1 %v217_v45  ;;  %538 = vmatpush.msra.mxu2 %v218_v46 }
  0x84   :  { %502 = vmatpush.msra.mxu0 %v112_v43 }
  0x85   :  { %519 = vmatpush.msra.mxu1 %v191_v48  ;;  %539 = vmatpush.msra.mxu2 %v192_v47 }
  0x86   :  { %v942_v60 = vpop.permute.xlu2 %766 }
  0x87   :  { %v931_v49 = vpop.permute.xlu1 %716  ;;  %v712_v50 = vpop.permute.xlu0 %711  ;;  %v769_v10 = vunpack.i.h.bf16 %v942_v60  ;;  %v768_v11 = vunpack.i.l.bf16 %v942_v60 }
  0x88   :  { %v719_v51 = vunpack.i.h.bf16 %v931_v49  ;;  %v718_v52 = vunpack.i.l.bf16 %v931_v49  ;;  %v714_v53 = vunpack.i.h.bf16 %v712_v50  ;;  %v713_v54 = vunpack.i.l.bf16 %v712_v50 }
  0x89   :  { %v323_v22 = vsel %vm111_vm4, %v768_v11, %v769_v10  ;;  %v754_v11 = vunpack.i.h.bf16 %v917_v34 }
  0x8a   :  { %v165_v55 = vsel %vm163_vm2, %v709_v19, %v713_v54  ;;  %v166_v56 = vsel %vm163_vm2, %v713_v54, %v714_v53  ;;  %v398_v57 = vsel %vm189_vm1, %v718_v52, %v719_v51  ;;  %v975_v52 = vld [vmem:[%s1046_s1] sm:$0xff] }
  0x8b   :  { %520 = vmatpush.msra.mxu1 %v165_v55  ;;  %540 = vmatpush.msra.mxu2 %v166_v56 }
  0x8c   :  { %559 = vmatpush.msra.mxu3 %v398_v57 }
  0x8e   :  { %v782_v18 = vpop.permute.xlu2 %781 }
  0x8f   :  { %v940_v58 = vpop.permute.xlu1 %731  ;;  %v727_v59 = vpop.permute.xlu0 %726  ;;  %v784_v23 = vunpack.i.h.bf16 %v782_v18  ;;  %v783_v30 = vunpack.i.l.bf16 %v782_v18 }
  0x90   :  { %v734_v61 = vunpack.i.h.bf16 %v940_v58  ;;  %v733_v62 = vunpack.i.l.bf16 %v940_v58  ;;  %v729_v63 = vunpack.i.h.bf16 %v727_v59  ;;  %v728_v3 = vunpack.i.l.bf16 %v727_v59 }
  0x91   :  { %v62_v35 = vsel %vm59_vm6, %v783_v30, %v784_v23 }
  0x92   :  { %v139_v5 = vsel %vm137_vm3, %v724_v27, %v728_v3  ;;  %v140_v7 = vsel %vm137_vm3, %v728_v3, %v729_v63  ;;  %v373_v8 = vsel %vm163_vm2, %v733_v62, %v734_v61 }
  0x93   :  { %521 = vmatpush.msra.mxu1 %v139_v5  ;;  %541 = vmatpush.msra.mxu2 %v140_v7 }
  0x94   :  { %560 = vmatpush.msra.mxu3 %v373_v8 }
  0x96   :  { %v797_v36 = vpop.permute.xlu2 %796 }
  0x97   :  { %v953_v12 = vpop.permute.xlu1 %746  ;;  %v742_v13 = vpop.permute.xlu0 %741  ;;  %v799_v37 = vunpack.i.h.bf16 %v797_v36  ;;  %v798_v39 = vunpack.i.l.bf16 %v797_v36 }
  0x98   :  { %v749_v14 = vunpack.i.h.bf16 %v953_v12  ;;  %v748_v15 = vunpack.i.l.bf16 %v953_v12  ;;  %v744_v16 = vunpack.i.h.bf16 %v742_v13  ;;  %v743_v17 = vunpack.i.l.bf16 %v742_v13 }
  0x99   :  { %v34_v46 = vsel %vm33_vm7, %v798_v39, %v799_v37 }
  0x9a   :  { %v113_v19 = vsel %vm111_vm4, %v739_v32, %v743_v17  ;;  %v114_v20 = vsel %vm111_vm4, %v743_v17, %v744_v16  ;;  %v348_v21 = vsel %vm137_vm3, %v748_v15, %v749_v14  ;;  %v425_v16 = vsel %vm215_vm0, %v753_v38, %v754_v11 }
  0x9b   :  { %522 = vmatpush.msra.mxu1 %v113_v19  ;;  %542 = vmatpush.msra.mxu2 %v114_v20 }
  0x9c   :  { %561 = vmatpush.msra.mxu3 %v348_v21 }
  0x9e   :  { %562 = vmatpush.msra.mxu3 %v323_v22  ;;  %v812_v50 = vpop.permute.xlu2 %811 }
  0x9f   :  { %v762_v24 = vpop.permute.xlu1 %761  ;;  %v757_v25 = vpop.permute.xlu0 %756  ;;  %v813_v59 = vunpack.i.l.bf16 %v812_v50  ;;  %v814_v17 = vunpack.i.h.bf16 %v812_v50 }
  0xa0   :  { %v764_v26 = vunpack.i.h.bf16 %v762_v24  ;;  %v763_v27 = vunpack.i.l.bf16 %v762_v24  ;;  %v759_v28 = vunpack.i.h.bf16 %v757_v25  ;;  %v758_v29 = vunpack.i.l.bf16 %v757_v25 }
  0xa2   :  { %v86_v31 = vsel %vm85_vm5, %v758_v29, %v759_v28  ;;  %v87_v32 = vsel %vm85_vm5, %v759_v28, %v763_v27  ;;  %v88_v33 = vsel %vm85_vm5, %v763_v27, %v764_v26  ;;  %v350_v26 = vsel %vm137_vm3, %v813_v59, %v814_v17 }
  0xa3   :  { %503 = vmatpush.msra.mxu0 %v86_v31  ;;  %523 = vmatpush.msra.mxu1 %v87_v32 }
  0xa4   :  { %543 = vmatpush.msra.mxu2 %v88_v33 }
  0xa6   :  { %544 = vmatpush.msra.mxu2 %v62_v35  ;;  %v827_v12 = vpop.permute.xlu2 %826 }
  0xa7   :  { %v772_v40 = vpop.permute.xlu0 %771  ;;  %v777_v41 = vpop.permute.xlu1 %776  ;;  %v828_v18 = vunpack.i.l.bf16 %v827_v12  ;;  %v829_v38 = vunpack.i.h.bf16 %v827_v12 }
  0xa8   :  { %v779_v42 = vunpack.i.h.bf16 %v777_v41  ;;  %v778_v43 = vunpack.i.l.bf16 %v777_v41  ;;  %v773_v48 = vunpack.i.l.bf16 %v772_v40  ;;  %v774_v15 = vunpack.i.h.bf16 %v772_v40 }
  0xa9   :  { %v300_v29 = vsel %vm85_vm5, %v828_v18, %v829_v38 }
  0xaa   :  { %v60_v45 = vsel %vm59_vm6, %v778_v43, %v779_v42  ;;  %v61_v47 = vsel %vm59_vm6, %v779_v42, %v783_v30  ;;  %v399_v62 = vsel %vm189_vm1, %v719_v51, %v773_v48  ;;  %v400_v21 = vsel %vm189_vm1, %v773_v48, %v774_v15 }
  0xab   :  { %504 = vmatpush.msra.mxu0 %v60_v45  ;;  %524 = vmatpush.msra.mxu1 %v61_v47 }
  0xad   :  { %505 = vmatpush.msra.mxu0 %v34_v46 }
  0xaf   :  { %v787_v53 = vpop.permute.xlu0 %786  ;;  %v792_v54 = vpop.permute.xlu1 %791  ;;  %506 = vmatpush.msra.mxu0 %v876_v2 }
  0xb0   :  { %v789_v55 = vunpack.i.h.bf16 %v787_v53  ;;  %v788_v56 = vunpack.i.l.bf16 %v787_v53  ;;  %v793_v57 = vunpack.i.l.bf16 %v792_v54  ;;  %663 = vmatmul.msk.f32.vlgmr.msra.gmra.mxu0 %vm487_vm8, %v975_v52 }
  0xb1   :  { %578 = vmatpush.msrb.mxu0 %v925_v44  ;;  %v349_v44 = vsel %vm137_vm3, %v749_v14, %v813_v59  ;;  %v794_v14 = vunpack.i.h.bf16 %v792_v54 }
  0xb2   :  { %v298_v63 = vsel %vm85_vm5, %v788_v56, %v789_v55  ;;  %v374_v2 = vsel %vm163_vm2, %v734_v61, %v793_v57  ;;  %v299_v28 = vsel %vm85_vm5, %v789_v55, %v828_v18 }
  0xb3   :  { %579 = vmatpush.msrb.mxu0 %v399_v62  ;;  %563 = vmatpush.msra.mxu3 %v298_v63 }
  0xb5   :  { %580 = vmatpush.msrb.mxu0 %v374_v2 }
  0xb7   :  { %581 = vmatpush.msrb.mxu0 %v349_v44  ;;  %v807_v49 = vpop.permute.xlu1 %806  ;;  %v802_v3 = vpop.permute.xlu0 %801 }
  0xb8   :  { %v809_v51 = vunpack.i.h.bf16 %v807_v49  ;;  %v808_v5 = vunpack.i.l.bf16 %v807_v49  ;;  %v804_v7 = vunpack.i.h.bf16 %v802_v3  ;;  %v803_v8 = vunpack.i.l.bf16 %v802_v3 }
  0xba   :  { %v35_v13 = vsel %vm33_vm7, %v799_v37, %v803_v8  ;;  %v36_v58 = vsel %vm33_vm7, %v803_v8, %v804_v7  ;;  %v273_v61 = vsel %vm59_vm6, %v808_v5, %v809_v51 }
  0xbb   :  { %525 = vmatpush.msra.mxu1 %v35_v13  ;;  %545 = vmatpush.msra.mxu2 %v36_v58 }
  0xbc   :  { %564 = vmatpush.msra.mxu3 %v273_v61 }
  0xbd   :  { %526 = vmatpush.msra.mxu1 %v883_v4  ;;  %546 = vmatpush.msra.mxu2 %v890_v6  ;;  %v375_v6 = vsel %vm163_vm2, %v793_v57, %v794_v14 }
  0xbe   :  { %665 = vmatmul.msk.f32.vlgmr.msra.gmra.mxu2 %vm487_vm8, %v975_v52  ;;  %664 = vmatmul.msk.f32.vlgmr.msra.gmra.mxu1 %vm487_vm8, %v975_v52 }
  0xbf   :  { %598 = vmatpush.msrb.mxu1 %v425_v16  ;;  %v822_v19 = vpop.permute.xlu1 %821  ;;  %v817_v20 = vpop.permute.xlu0 %816 }
  0xc0   :  { %v824_v4 = vunpack.i.h.bf16 %v822_v19  ;;  %v823_v22 = vunpack.i.l.bf16 %v822_v19  ;;  %v819_v34 = vunpack.i.h.bf16 %v817_v20  ;;  %v818_v23 = vunpack.i.l.bf16 %v817_v20 }
  0xc1   :  { %599 = vmatpush.msrb.mxu1 %v400_v21 }
  0xc2   :  { %v248_v24 = vsel %vm33_vm7, %v818_v23, %v819_v34  ;;  %v324_v25 = vsel %vm111_vm4, %v769_v10, %v823_v22  ;;  %v325_v27 = vsel %vm111_vm4, %v823_v22, %v824_v4 }
  0xc3   :  { %600 = vmatpush.msrb.mxu1 %v375_v6  ;;  %565 = vmatpush.msra.mxu3 %v248_v24 }
  0xc4   :  { %582 = vmatpush.msrb.mxu0 %v324_v25 }
  0xc5   :  { %601 = vmatpush.msrb.mxu1 %v350_v26  ;;  %566 = vmatpush.msra.mxu3 %v866_v0 }
  0xc6   :  { %583 = vmatpush.msrb.mxu0 %v299_v28  ;;  %666 = vmatmul.msk.f32.vlgmr.msra.gmra.mxu3 %vm487_vm8, %v975_v52 }
  0xc7   :  { %602 = vmatpush.msrb.mxu1 %v325_v27  ;;  %v837_v60 = vpop.permute.xlu1 %836  ;;  %v832_v10 = vpop.permute.xlu0 %831 }
  0xc8   :  { %v839_v30 = vunpack.i.h.bf16 %v837_v60  ;;  %v838_v31 = vunpack.i.l.bf16 %v837_v60  ;;  %v834_v32 = vunpack.i.h.bf16 %v832_v10  ;;  %v833_v33 = vunpack.i.l.bf16 %v832_v10 }
  0xc9   :  { %603 = vmatpush.msrb.mxu1 %v300_v29 }
  0xca   :  { %v274_v35 = vsel %vm59_vm6, %v809_v51, %v833_v33  ;;  %v275_v36 = vsel %vm59_vm6, %v833_v33, %v834_v32  ;;  %v250_v37 = vsel %vm33_vm7, %v838_v31, %v839_v30  ;;  %v249_v0 = vsel %vm33_vm7, %v819_v34, %v838_v31 }
  0xcb   :  { %584 = vmatpush.msrb.mxu0 %v274_v35  ;;  %604 = vmatpush.msrb.mxu1 %v275_v36 }
  0xcd   :  { %585 = vmatpush.msrb.mxu0 %v249_v0  ;;  %605 = vmatpush.msrb.mxu1 %v250_v37 }
  0xcf   :  { %586 = vmatpush.msrb.mxu0 %v871_v1  ;;  %606 = vmatpush.msrb.mxu1 %v899_v9 }
  0xd0   :  { %667 = vmatmul.msk.f32.vlgmr.msrb.gmra.mxu0 %vm487_vm8, %v975_v52  ;;  %668 = vmatmul.msk.f32.vlgmr.msrb.gmra.mxu1 %vm487_vm8, %v975_v52 }
 0x12d   :  { %v508_v39 = vpop.f32.mrf.mxu0 }
 0x12e   :  { %v611_v40 = vmax.f32 %v508_v39, 0.0 }
 0x130   :  { %614 = vst [vmem:[%s1047_s2] sm:$0xff] %v611_v40 }
 0x13b   :  { %v528_v41 = vpop.f32.mrf.mxu1 }
 0x13c   :  { %v612_v42 = vmax.f32 %v528_v41, 0.0 }
 0x13e   :  { %615 = vst [vmem:[%s1047_s2 + $0x8] sm:$0xff] %v612_v42 }
 0x141   :  { %v548_v1 = vpop.f32.mrf.mxu2 }
 0x142   :  { %v613_v9 = vmax.f32 %v548_v1, 0.0 }
 0x144   :  { %616 = vst [vmem:[%s1047_s2 + $0x10] sm:$0xff] %v613_v9 }
 0x149   :  { %v568_v43 = vpop.f32.mrf.mxu3 }
 0x14a   :  { %v617_v45 = vmax.f32 %v568_v43, 0.0 }
 0x14c   :  { %669 = vst [vmem:[%s1047_s2 + $0x18] sm:$0xff] %v617_v45 }
 0x14d   :  { %v588_v46 = vpop.f32.mrf.mxu0  ;;  %v608_v47 = vpop.f32.mrf.mxu1 }
 0x14e   :  { %v618_v48 = vmax.f32 %v588_v46, 0.0  ;;  %v619_v50 = vmax.f32 %v608_v47, 0.0 }
 0x150   :  { %670 = vst [vmem:[%s1047_s2 + $0x20] sm:$0xff] %v618_v48 }
 0x151   :  { %671 = vst [vmem:[%s1047_s2 + $0x28] sm:$0xff] %v619_v50 }

</bundles_post_ra>
